<compile_context>
chip_gen: v7x
topology: tpu7x:2x2x1
jax: 0.10.0
libtpu: 0.0.40
codegen_flags: <defaults>
</compile_context>

<pallas_src>
import math
import functools

import jax
import jax.numpy as jnp
from jax import lax
from jax.experimental import pallas as pl
from jax.experimental.pallas import tpu as pltpu


# ----------------------------------------------------------------------------
# Fused kernel:  out[:, :Cin]  = x
#                out[:, Cin:]  = conv3x3( relu(conv1x1_s2folded(relu(bn1(x))) + b2) )
# Channel-major (C, H*W) layout: the pixel axis sits on lanes (lane-dense,
# NCHW-native, free reshapes at both boundaries).
# ----------------------------------------------------------------------------
def _bottleneck_kernel(x_ref, masks_ref, s1_ref, b1_ref, w1_ref, b2_ref, w2_ref,
                       o_ref, *, H, W, compute_dtype):
    HW = H * W
    b_tile = x_ref.shape[0]
    c_out = w2_ref.shape[1]

    # Grid-invariant operands: load once per grid step, hoisted out of loops.
    masks = masks_ref[...]            # (9, HW)  f32 per-tap boundary masks
    s1 = s1_ref[...]                  # (Cin, 1) f32
    b1 = b1_ref[...]                  # (Cin, 1) f32
    w1 = w1_ref[...]                  # (inter, Cin)  compute dtype, bn2 scale folded
    b2 = b2_ref[...]                  # (inter, 1) f32
    w2 = w2_ref[...]                  # (9, Cout, inter) compute dtype

    for b in range(b_tile):                               # static unroll over images
        x = x_ref[b].astype(jnp.float32)                  # (Cin, HW)

        # ---- bn1 + relu (VPU, f32) --------------------------------------------
        xn = jnp.maximum(x * s1 + b1, 0.0)

        # ---- 1x1 conv (s2 pre-folded into w1): one MXU matmul, f32 accum ------
        h = jnp.dot(w1, xn.astype(compute_dtype),
                    preferred_element_type=jnp.float32)   # (inter, HW)

        # ---- bn2 shift + relu (VPU, f32) ---------------------------------------
        h = jnp.maximum(h + b2, 0.0)

        # ---- 3x3 "same" conv: 9 accumulated tap matmuls ------------------------
        # Halo handling: lane-aligned rolls of the flat (inter, HW) buffer (XLU)
        # plus precomputed left/right/top/bottom wrap masks (VPU). No padded
        # buffer, no unaligned slices, no materialized im2col matrix.
        conv = jnp.zeros((c_out, HW), jnp.float32)
        for t in range(9):
            dy, dx = divmod(t, 3)
            s = (dy - 1) * W + (dx - 1)                   # flat pixel shift of this tap
            rolled = pltpu.roll(h, shift=(-s) % HW, axis=1) if s != 0 else h
            if dy == 1 and dx == 1:                       # center tap needs no mask
                slab = rolled.astype(compute_dtype)
            else:
                slab = (rolled * masks[t:t + 1, :]).astype(compute_dtype)
            conv = conv + jnp.dot(w2[t], slab,
                                  preferred_element_type=jnp.float32)

        # ---- fused concat -> single lane-dense, unmasked store -----------------
        o_ref[b] = jnp.concatenate([x, conv], axis=0).astype(o_ref.dtype)


def _pick_batch_tile(n):
    # Amortize the ~0.35 us/grid-step overhead, but keep >= 2 grid steps when
    # possible so v7x's two TensorCores both stay busy.
    cap = max(1, min(8, n // 2))
    for bt in range(cap, 0, -1):
        if n % bt == 0:
            return bt
    return 1


# ----------------------------------------------------------------------------
# Wrapper: BN folding, weight re-layout, mask precompute, grid/BlockSpec plumbing.
# ----------------------------------------------------------------------------
@functools.partial(jax.jit, static_argnames=("compute_dtype",))
def bottleneck_block_forward(x_nchw, params, compute_dtype=jnp.bfloat16):
    eps = 1e-5
    N, Cin, H, W = x_nchw.shape
    inter = params["conv1_w"].shape[0]
    Cout = params["conv2_w"].shape[0]
    HW = H * W
    io_dtype = x_nchw.dtype

    # Fold BN (eval mode) into per-channel scale/shift (f32).
    s1 = (params["bn1_gamma"] / jnp.sqrt(params["bn1_var"] + eps)).astype(jnp.float32)
    b1 = (params["bn1_beta"] - params["bn1_mean"] * s1).astype(jnp.float32)
    s2 = (params["bn2_gamma"] / jnp.sqrt(params["bn2_var"] + eps)).astype(jnp.float32)
    b2 = (params["bn2_beta"] - params["bn2_mean"] * s2).astype(jnp.float32)

    # conv1: (inter, Cin, 1, 1) -> (inter, Cin); bn2 scale folded in exactly
    # (conv1 is linear), pre-cast to the MXU compute dtype.
    w1_eff = (params["conv1_w"][:, :, 0, 0] * s2[:, None]).astype(compute_dtype)
    # conv2: (Cout, inter, 3, 3) -> per-tap weights (9, Cout, inter), tap-major.
    w2t = jnp.transpose(params["conv2_w"], (2, 3, 0, 1)) \
             .reshape(9, Cout, inter).astype(compute_dtype)

    # NCHW is already channel-major: flattening pixels is a free reshape.
    # Keep the caller's precision (no forced f32 cast -> bf16 callers get bf16 I/O).
    x_flat = x_nchw.reshape(N, Cin, HW)

    # Per-tap boundary masks (kill row/column wrap of the lane rolls), f32.
    rr = jnp.arange(HW, dtype=jnp.int32) // W
    cc = jnp.arange(HW, dtype=jnp.int32) % W
    tap_masks = []
    for dy in range(3):
        oky = jnp.ones((HW,), bool) if dy == 1 else (rr >= 1 if dy == 0 else rr <= H - 2)
        for dx in range(3):
            okx = jnp.ones((HW,), bool) if dx == 1 else (cc >= 1 if dx == 0 else cc <= W - 2)
            tap_masks.append(jnp.logical_and(oky, okx).astype(jnp.float32))
    masks = jnp.stack(tap_masks, axis=0)                   # (9, HW)

    b_tile = _pick_batch_tile(N)

    kernel = functools.partial(_bottleneck_kernel, H=H, W=W,
                               compute_dtype=compute_dtype)

    grid_spec = pltpu.PrefetchScalarGridSpec(
        num_scalar_prefetch=0,
        grid=(N // b_tile,),
        in_specs=[
            pl.BlockSpec((b_tile, Cin, HW), lambda n: (n, 0, 0)),   # x (per batch tile)
            pl.BlockSpec((9, HW), lambda n: (0, 0)),                # tap masks
            pl.BlockSpec((Cin, 1), lambda n: (0, 0)),               # s1
            pl.BlockSpec((Cin, 1), lambda n: (0, 0)),               # b1
            pl.BlockSpec((inter, Cin), lambda n: (0, 0)),           # w1 (s2 folded, bf16)
            pl.BlockSpec((inter, 1), lambda n: (0, 0)),             # b2
            pl.BlockSpec((9, Cout, inter), lambda n: (0, 0, 0)),    # w2 per-tap (bf16)
        ],
        out_specs=pl.BlockSpec((b_tile, Cin + Cout, HW), lambda n: (n, 0, 0)),
    )

    io_bytes = jnp.dtype(io_dtype).itemsize
    w_bytes = jnp.dtype(compute_dtype).itemsize
    flops = 2 * N * HW * (Cin * inter + 9 * inter * Cout)
    bytes_accessed = (io_bytes * N * HW * (2 * Cin + Cout)
                      + w_bytes * (inter * Cin + 9 * Cout * inter)
                      + 4 * (9 * HW + 2 * Cin + inter))

    out_flat = pl.pallas_call(
        kernel,
        out_shape=jax.ShapeDtypeStruct((N, Cin + Cout, HW), io_dtype),
        grid_spec=grid_spec,
        compiler_params=pltpu.CompilerParams(
            dimension_semantics=("parallel",),        # batch-tile axis across TCs (v7x)
            vmem_limit_bytes=32 * 1024 * 1024,        # safe on all of v5e/v6e/v7x
        ),
        cost_estimate=pl.CostEstimate(flops=flops, transcendentals=0,
                                      bytes_accessed=bytes_accessed),
    )(x_flat, masks,
      s1.reshape(Cin, 1), b1.reshape(Cin, 1),
      w1_eff, b2.reshape(inter, 1), w2t)

    # Free reshape back to NCHW (no transpose, no concat pass in XLA).
    return out_flat.reshape(N, Cin + Cout, H, W)


# ----------------------------------------------------------------------------
# Pure-JAX reference for verification.
# ----------------------------------------------------------------------------
def _reference(x, params):
    eps = 1e-5

    def bn(x, g, b, m, v):
        return (g[None, :, None, None] * (x - m[None, :, None, None])
                / jnp.sqrt(v[None, :, None, None] + eps) + b[None, :, None, None])

    h = jnp.maximum(bn(x, params["bn1_gamma"], params["bn1_beta"],
                       params["bn1_mean"], params["bn1_var"]), 0.0)
    h = lax.conv_general_dilated(h, params["conv1_w"], (1, 1), "VALID",
                                 dimension_numbers=("NCHW", "OIHW", "NCHW"))
    h = jnp.maximum(bn(h, params["bn2_gamma"], params["bn2_beta"],
                       params["bn2_mean"], params["bn2_var"]), 0.0)
    h = lax.conv_general_dilated(h, params["conv2_w"], (1, 1), ((1, 1), (1, 1)),
                                 dimension_numbers=("NCHW", "OIHW", "NCHW"))
    return jnp.concatenate([x, h], axis=1)


def make_params(key, in_planes, out_planes):
    inter = out_planes * 4
    ks = jax.random.split(key, 10)
    return {
        "bn1_gamma": 1.0 + 0.1 * jax.random.normal(ks[0], (in_planes,), jnp.float32),
        "bn1_beta": 0.1 * jax.random.normal(ks[1], (in_planes,), jnp.float32),
        "bn1_mean": 0.05 * jax.random.normal(ks[2], (in_planes,), jnp.float32),
        "bn1_var": 1.0 + 0.1 * jax.random.uniform(ks[3], (in_planes,), jnp.float32),
        "conv1_w": jax.random.normal(ks[4], (inter, in_planes, 1, 1), jnp.float32)
                   * (1.0 / math.sqrt(in_planes)),
        "bn2_gamma": 1.0 + 0.1 * jax.random.normal(ks[5], (inter,), jnp.float32),
        "bn2_beta": 0.1 * jax.random.normal(ks[6], (inter,), jnp.float32),
        "bn2_mean": 0.05 * jax.random.normal(ks[7], (inter,), jnp.float32),
        "bn2_var": 1.0 + 0.1 * jax.random.uniform(ks[8], (inter,), jnp.float32),
        "conv2_w": jax.random.normal(ks[9], (out_planes, inter, 3, 3), jnp.float32)
                   * (1.0 / math.sqrt(9 * inter)),
    }


if __name__ == "__main__":
    N, Cin, H, W = 2, 4, 16, 16
    out_planes = 8                      # inter_planes = 32

    key = jax.random.PRNGKey(0)
    kx, kp = jax.random.split(key)
    x = jax.random.normal(kx, (N, Cin, H, W), jnp.float32)
    params = make_params(kp, Cin, out_planes)

    ref = jax.block_until_ready(_reference(x, params))

    # f32 compute path: tight numerical check of the fused kernel structure.
    out_f32 = jax.block_until_ready(
        bottleneck_block_forward(x, params, compute_dtype=jnp.float32))
    assert out_f32.shape == (N, Cin + out_planes, H, W), out_f32.shape
    assert jnp.allclose(out_f32, ref, rtol=1e-4, atol=1e-4), \
        float(jnp.max(jnp.abs(out_f32 - ref)))

    # Default bf16-MXU path (f32 accumulation): looser tolerance for bf16 rounding.
    out_bf16 = jax.block_until_ready(bottleneck_block_forward(x, params))
    assert out_bf16.shape == (N, Cin + out_planes, H, W), out_bf16.shape
    assert jnp.allclose(out_bf16, ref, rtol=5e-2, atol=5e-2), \
        float(jnp.max(jnp.abs(out_bf16 - ref)))

    print("KERNEL_OK")
</pallas_src>

<mosaic_0001>
module attributes {stable_mosaic.version = 11 : i64} {
  func.func @_bottleneck_kernel(%arg0: i32, %arg1: memref<1x4x256xf32, #tpu.memory_space<vmem>>, %arg2: memref<9x256xf32, #tpu.memory_space<vmem>>, %arg3: memref<4x1xf32, #tpu.memory_space<vmem>>, %arg4: memref<4x1xf32, #tpu.memory_space<vmem>>, %arg5: memref<32x4xf32, #tpu.memory_space<vmem>>, %arg6: memref<32x1xf32, #tpu.memory_space<vmem>>, %arg7: memref<9x8x32xf32, #tpu.memory_space<vmem>>, %arg8: memref<1x12x256xf32, #tpu.memory_space<vmem>>) attributes {dimension_semantics = [#tpu.dimension_semantics<parallel>], iteration_bounds = array<i64: 2>, scalar_prefetch = 0 : i64, scratch_operands = 0 : i64, tpu.core_type = #tpu.core_type<tc>, window_params = [{transform_indices = @transform_0, window_bounds = array<i64: 1, 4, 256>}, {pipeline_mode = #tpu.pipeline_mode<synchronous>, transform_indices = @transform_1, window_bounds = array<i64: 9, 256>}, {pipeline_mode = #tpu.pipeline_mode<synchronous>, transform_indices = @transform_2, window_bounds = array<i64: 4, 1>}, {pipeline_mode = #tpu.pipeline_mode<synchronous>, transform_indices = @transform_3, window_bounds = array<i64: 4, 1>}, {pipeline_mode = #tpu.pipeline_mode<synchronous>, transform_indices = @transform_4, window_bounds = array<i64: 32, 4>}, {pipeline_mode = #tpu.pipeline_mode<synchronous>, transform_indices = @transform_5, window_bounds = array<i64: 32, 1>}, {pipeline_mode = #tpu.pipeline_mode<synchronous>, transform_indices = @transform_6, window_bounds = array<i64: 9, 8, 32>}, {transform_indices = @transform_7, window_bounds = array<i64: 1, 12, 256>}]} {
    %c0 = arith.constant 0 : index
    %c0_0 = arith.constant 0 : index
    %0 = vector.load %arg2[%c0, %c0_0] : memref<9x256xf32, #tpu.memory_space<vmem>>, vector<9x256xf32>
    %c0_1 = arith.constant 0 : index
    %c0_2 = arith.constant 0 : index
    %1 = vector.load %arg3[%c0_1, %c0_2] : memref<4x1xf32, #tpu.memory_space<vmem>>, vector<4x1xf32>
    %c0_3 = arith.constant 0 : index
    %c0_4 = arith.constant 0 : index
    %2 = vector.load %arg4[%c0_3, %c0_4] : memref<4x1xf32, #tpu.memory_space<vmem>>, vector<4x1xf32>
    %c0_5 = arith.constant 0 : index
    %c0_6 = arith.constant 0 : index
    %3 = vector.load %arg5[%c0_5, %c0_6] : memref<32x4xf32, #tpu.memory_space<vmem>>, vector<32x4xf32>
    %c0_7 = arith.constant 0 : index
    %c0_8 = arith.constant 0 : index
    %4 = vector.load %arg6[%c0_7, %c0_8] : memref<32x1xf32, #tpu.memory_space<vmem>>, vector<32x1xf32>
    %c0_9 = arith.constant 0 : index
    %c0_10 = arith.constant 0 : index
    %c0_11 = arith.constant 0 : index
    %5 = vector.load %arg7[%c0_9, %c0_10, %c0_11] : memref<9x8x32xf32, #tpu.memory_space<vmem>>, vector<9x8x32xf32>
    %c0_12 = arith.constant 0 : index
    %c0_13 = arith.constant 0 : index
    %c0_14 = arith.constant 0 : index
    %6 = vector.load %arg1[%c0_12, %c0_13, %c0_14] : memref<1x4x256xf32, #tpu.memory_space<vmem>>, vector<1x4x256xf32>
    %7 = vector.shape_cast %6 : vector<1x4x256xf32> to vector<4x256xf32>
    %8 = vector.broadcast %1 : vector<4x1xf32> to vector<4x256xf32>
    %9 = arith.mulf %7, %8 : vector<4x256xf32>
    %10 = vector.broadcast %2 : vector<4x1xf32> to vector<4x256xf32>
    %11 = arith.addf %9, %10 : vector<4x256xf32>
    %cst = arith.constant 0.000000e+00 : f32
    %12 = vector.broadcast %cst : f32 to vector<4x256xf32>
    %13 = arith.maximumf %11, %12 : vector<4x256xf32>
    %cst_15 = arith.constant dense<0.000000e+00> : vector<32x256xf32>
    %14 = tpu.matmul %3, %13, %cst_15 {dimension_numbers = #tpu.dot_dimension_numbers<[1], [0], [0], [1], [0, 0, 1, 1], [], []>} : vector<32x4xf32>, vector<4x256xf32>, vector<32x256xf32> -> vector<32x256xf32>
    %15 = vector.broadcast %4 : vector<32x1xf32> to vector<32x256xf32>
    %16 = arith.addf %14, %15 : vector<32x256xf32>
    %cst_16 = arith.constant 0.000000e+00 : f32
    %17 = vector.broadcast %cst_16 : f32 to vector<32x256xf32>
    %18 = arith.maximumf %16, %17 : vector<32x256xf32>
    %cst_17 = arith.constant 0.000000e+00 : f32
    %19 = vector.broadcast %cst_17 : f32 to vector<8x256xf32>
    %c17_i32 = arith.constant 17 : i32
    %20 = tpu.dynamic_rotate %18 by %c17_i32 dim 1 : vector<32x256xf32>, i32 -> vector<32x256xf32>
    %21 = vector.extract_strided_slice %0 {offsets = [0, 0], sizes = [1, 256], strides = [1, 1]} : vector<9x256xf32> to vector<1x256xf32>
    %22 = vector.broadcast %21 : vector<1x256xf32> to vector<32x256xf32>
    %23 = arith.mulf %20, %22 : vector<32x256xf32>
    %24 = vector.extract_strided_slice %5 {offsets = [0, 0, 0], sizes = [1, 8, 32], strides = [1, 1, 1]} : vector<9x8x32xf32> to vector<1x8x32xf32>
    %25 = vector.shape_cast %24 : vector<1x8x32xf32> to vector<8x32xf32>
    %cst_18 = arith.constant dense<0.000000e+00> : vector<8x256xf32>
    %26 = tpu.matmul %25, %23, %cst_18 {dimension_numbers = #tpu.dot_dimension_numbers<[1], [0], [0], [1], [0, 0, 1, 1], [], []>} : vector<8x32xf32>, vector<32x256xf32>, vector<8x256xf32> -> vector<8x256xf32>
    %27 = arith.addf %19, %26 : vector<8x256xf32>
    %c16_i32 = arith.constant 16 : i32
    %28 = tpu.dynamic_rotate %18 by %c16_i32 dim 1 : vector<32x256xf32>, i32 -> vector<32x256xf32>
    %29 = vector.extract_strided_slice %0 {offsets = [1, 0], sizes = [1, 256], strides = [1, 1]} : vector<9x256xf32> to vector<1x256xf32>
    %30 = vector.broadcast %29 : vector<1x256xf32> to vector<32x256xf32>
    %31 = arith.mulf %28, %30 : vector<32x256xf32>
    %32 = vector.extract_strided_slice %5 {offsets = [1, 0, 0], sizes = [1, 8, 32], strides = [1, 1, 1]} : vector<9x8x32xf32> to vector<1x8x32xf32>
    %33 = vector.shape_cast %32 : vector<1x8x32xf32> to vector<8x32xf32>
    %cst_19 = arith.constant dense<0.000000e+00> : vector<8x256xf32>
    %34 = tpu.matmul %33, %31, %cst_19 {dimension_numbers = #tpu.dot_dimension_numbers<[1], [0], [0], [1], [0, 0, 1, 1], [], []>} : vector<8x32xf32>, vector<32x256xf32>, vector<8x256xf32> -> vector<8x256xf32>
    %35 = arith.addf %27, %34 : vector<8x256xf32>
    %c15_i32 = arith.constant 15 : i32
    %36 = tpu.dynamic_rotate %18 by %c15_i32 dim 1 : vector<32x256xf32>, i32 -> vector<32x256xf32>
    %37 = vector.extract_strided_slice %0 {offsets = [2, 0], sizes = [1, 256], strides = [1, 1]} : vector<9x256xf32> to vector<1x256xf32>
    %38 = vector.broadcast %37 : vector<1x256xf32> to vector<32x256xf32>
    %39 = arith.mulf %36, %38 : vector<32x256xf32>
    %40 = vector.extract_strided_slice %5 {offsets = [2, 0, 0], sizes = [1, 8, 32], strides = [1, 1, 1]} : vector<9x8x32xf32> to vector<1x8x32xf32>
    %41 = vector.shape_cast %40 : vector<1x8x32xf32> to vector<8x32xf32>
    %cst_20 = arith.constant dense<0.000000e+00> : vector<8x256xf32>
    %42 = tpu.matmul %41, %39, %cst_20 {dimension_numbers = #tpu.dot_dimension_numbers<[1], [0], [0], [1], [0, 0, 1, 1], [], []>} : vector<8x32xf32>, vector<32x256xf32>, vector<8x256xf32> -> vector<8x256xf32>
    %43 = arith.addf %35, %42 : vector<8x256xf32>
    %c1_i32 = arith.constant 1 : i32
    %44 = tpu.dynamic_rotate %18 by %c1_i32 dim 1 : vector<32x256xf32>, i32 -> vector<32x256xf32>
    %45 = vector.extract_strided_slice %0 {offsets = [3, 0], sizes = [1, 256], strides = [1, 1]} : vector<9x256xf32> to vector<1x256xf32>
    %46 = vector.broadcast %45 : vector<1x256xf32> to vector<32x256xf32>
    %47 = arith.mulf %44, %46 : vector<32x256xf32>
    %48 = vector.extract_strided_slice %5 {offsets = [3, 0, 0], sizes = [1, 8, 32], strides = [1, 1, 1]} : vector<9x8x32xf32> to vector<1x8x32xf32>
    %49 = vector.shape_cast %48 : vector<1x8x32xf32> to vector<8x32xf32>
    %cst_21 = arith.constant dense<0.000000e+00> : vector<8x256xf32>
    %50 = tpu.matmul %49, %47, %cst_21 {dimension_numbers = #tpu.dot_dimension_numbers<[1], [0], [0], [1], [0, 0, 1, 1], [], []>} : vector<8x32xf32>, vector<32x256xf32>, vector<8x256xf32> -> vector<8x256xf32>
    %51 = arith.addf %43, %50 : vector<8x256xf32>
    %52 = vector.extract_strided_slice %5 {offsets = [4, 0, 0], sizes = [1, 8, 32], strides = [1, 1, 1]} : vector<9x8x32xf32> to vector<1x8x32xf32>
    %53 = vector.shape_cast %52 : vector<1x8x32xf32> to vector<8x32xf32>
    %cst_22 = arith.constant dense<0.000000e+00> : vector<8x256xf32>
    %54 = tpu.matmul %53, %18, %cst_22 {dimension_numbers = #tpu.dot_dimension_numbers<[1], [0], [0], [1], [0, 0, 1, 1], [], []>} : vector<8x32xf32>, vector<32x256xf32>, vector<8x256xf32> -> vector<8x256xf32>
    %55 = arith.addf %51, %54 : vector<8x256xf32>
    %c255_i32 = arith.constant 255 : i32
    %56 = tpu.dynamic_rotate %18 by %c255_i32 dim 1 : vector<32x256xf32>, i32 -> vector<32x256xf32>
    %57 = vector.extract_strided_slice %0 {offsets = [5, 0], sizes = [1, 256], strides = [1, 1]} : vector<9x256xf32> to vector<1x256xf32>
    %58 = vector.broadcast %57 : vector<1x256xf32> to vector<32x256xf32>
    %59 = arith.mulf %56, %58 : vector<32x256xf32>
    %60 = vector.extract_strided_slice %5 {offsets = [5, 0, 0], sizes = [1, 8, 32], strides = [1, 1, 1]} : vector<9x8x32xf32> to vector<1x8x32xf32>
    %61 = vector.shape_cast %60 : vector<1x8x32xf32> to vector<8x32xf32>
    %cst_23 = arith.constant dense<0.000000e+00> : vector<8x256xf32>
    %62 = tpu.matmul %61, %59, %cst_23 {dimension_numbers = #tpu.dot_dimension_numbers<[1], [0], [0], [1], [0, 0, 1, 1], [], []>} : vector<8x32xf32>, vector<32x256xf32>, vector<8x256xf32> -> vector<8x256xf32>
    %63 = arith.addf %55, %62 : vector<8x256xf32>
    %c241_i32 = arith.constant 241 : i32
    %64 = tpu.dynamic_rotate %18 by %c241_i32 dim 1 : vector<32x256xf32>, i32 -> vector<32x256xf32>
    %65 = vector.extract_strided_slice %0 {offsets = [6, 0], sizes = [1, 256], strides = [1, 1]} : vector<9x256xf32> to vector<1x256xf32>
    %66 = vector.broadcast %65 : vector<1x256xf32> to vector<32x256xf32>
    %67 = arith.mulf %64, %66 : vector<32x256xf32>
    %68 = vector.extract_strided_slice %5 {offsets = [6, 0, 0], sizes = [1, 8, 32], strides = [1, 1, 1]} : vector<9x8x32xf32> to vector<1x8x32xf32>
    %69 = vector.shape_cast %68 : vector<1x8x32xf32> to vector<8x32xf32>
    %cst_24 = arith.constant dense<0.000000e+00> : vector<8x256xf32>
    %70 = tpu.matmul %69, %67, %cst_24 {dimension_numbers = #tpu.dot_dimension_numbers<[1], [0], [0], [1], [0, 0, 1, 1], [], []>} : vector<8x32xf32>, vector<32x256xf32>, vector<8x256xf32> -> vector<8x256xf32>
    %71 = arith.addf %63, %70 : vector<8x256xf32>
    %c240_i32 = arith.constant 240 : i32
    %72 = tpu.dynamic_rotate %18 by %c240_i32 dim 1 : vector<32x256xf32>, i32 -> vector<32x256xf32>
    %73 = vector.extract_strided_slice %0 {offsets = [7, 0], sizes = [1, 256], strides = [1, 1]} : vector<9x256xf32> to vector<1x256xf32>
    %74 = vector.broadcast %73 : vector<1x256xf32> to vector<32x256xf32>
    %75 = arith.mulf %72, %74 : vector<32x256xf32>
    %76 = vector.extract_strided_slice %5 {offsets = [7, 0, 0], sizes = [1, 8, 32], strides = [1, 1, 1]} : vector<9x8x32xf32> to vector<1x8x32xf32>
    %77 = vector.shape_cast %76 : vector<1x8x32xf32> to vector<8x32xf32>
    %cst_25 = arith.constant dense<0.000000e+00> : vector<8x256xf32>
    %78 = tpu.matmul %77, %75, %cst_25 {dimension_numbers = #tpu.dot_dimension_numbers<[1], [0], [0], [1], [0, 0, 1, 1], [], []>} : vector<8x32xf32>, vector<32x256xf32>, vector<8x256xf32> -> vector<8x256xf32>
    %79 = arith.addf %71, %78 : vector<8x256xf32>
    %c239_i32 = arith.constant 239 : i32
    %80 = tpu.dynamic_rotate %18 by %c239_i32 dim 1 : vector<32x256xf32>, i32 -> vector<32x256xf32>
    %81 = vector.extract_strided_slice %0 {offsets = [8, 0], sizes = [1, 256], strides = [1, 1]} : vector<9x256xf32> to vector<1x256xf32>
    %82 = vector.broadcast %81 : vector<1x256xf32> to vector<32x256xf32>
    %83 = arith.mulf %80, %82 : vector<32x256xf32>
    %84 = vector.extract_strided_slice %5 {offsets = [8, 0, 0], sizes = [1, 8, 32], strides = [1, 1, 1]} : vector<9x8x32xf32> to vector<1x8x32xf32>
    %85 = vector.shape_cast %84 : vector<1x8x32xf32> to vector<8x32xf32>
    %cst_26 = arith.constant dense<0.000000e+00> : vector<8x256xf32>
    %86 = tpu.matmul %85, %83, %cst_26 {dimension_numbers = #tpu.dot_dimension_numbers<[1], [0], [0], [1], [0, 0, 1, 1], [], []>} : vector<8x32xf32>, vector<32x256xf32>, vector<8x256xf32> -> vector<8x256xf32>
    %87 = arith.addf %79, %86 : vector<8x256xf32>
    %88 = tpu.concatenate %7, %87 in 0 : vector<4x256xf32>, vector<8x256xf32> -> vector<12x256xf32>
    %c0_27 = arith.constant 0 : index
    %c0_28 = arith.constant 0 : index
    %c0_29 = arith.constant 0 : index
    %89 = vector.load %arg8[%c0_27, %c0_28, %c0_29] : memref<1x12x256xf32, #tpu.memory_space<vmem>>, vector<1x12x256xf32>
    %90 = vector.shape_cast %89 : vector<1x12x256xf32> to vector<12x256xf32>
    %91 = vector.shape_cast %88 : vector<12x256xf32> to vector<1x12x256xf32>
    tpu.vector_store %arg8[%c0_27, %c0_28, %c0_29], %91 {strides = array<i32>} : memref<1x12x256xf32, #tpu.memory_space<vmem>>, vector<1x12x256xf32>,
    return
  }
  func.func @transform_0(%arg0: i32) -> (i32, i32, i32) {
    %c0_i32 = arith.constant 0 : i32
    %c0_i32_0 = arith.constant 0 : i32
    %c0_i32_1 = arith.constant 0 : i32
    return %arg0, %c0_i32, %c0_i32_0 : i32, i32, i32
  }
  func.func @transform_1(%arg0: i32) -> (i32, i32) {
    %c0_i32 = arith.constant 0 : i32
    %c0_i32_0 = arith.constant 0 : i32
    %c0_i32_1 = arith.constant 0 : i32
    return %c0_i32, %c0_i32_0 : i32, i32
  }
  func.func @transform_2(%arg0: i32) -> (i32, i32) {
    %c0_i32 = arith.constant 0 : i32
    %c0_i32_0 = arith.constant 0 : i32
    %c0_i32_1 = arith.constant 0 : i32
    return %c0_i32, %c0_i32_0 : i32, i32
  }
  func.func @transform_3(%arg0: i32) -> (i32, i32) {
    %c0_i32 = arith.constant 0 : i32
    %c0_i32_0 = arith.constant 0 : i32
    %c0_i32_1 = arith.constant 0 : i32
    return %c0_i32, %c0_i32_0 : i32, i32
  }
  func.func @transform_4(%arg0: i32) -> (i32, i32) {
    %c0_i32 = arith.constant 0 : i32
    %c0_i32_0 = arith.constant 0 : i32
    %c0_i32_1 = arith.constant 0 : i32
    return %c0_i32, %c0_i32_0 : i32, i32
  }
  func.func @transform_5(%arg0: i32) -> (i32, i32) {
    %c0_i32 = arith.constant 0 : i32
    %c0_i32_0 = arith.constant 0 : i32
    %c0_i32_1 = arith.constant 0 : i32
    return %c0_i32, %c0_i32_0 : i32, i32
  }
  func.func @transform_6(%arg0: i32) -> (i32, i32, i32) {
    %c0_i32 = arith.constant 0 : i32
    %c0_i32_0 = arith.constant 0 : i32
    %c0_i32_1 = arith.constant 0 : i32
    %c0_i32_2 = arith.constant 0 : i32
    return %c0_i32, %c0_i32_0, %c0_i32_1 : i32, i32, i32
  }
  func.func @transform_7(%arg0: i32) -> (i32, i32, i32) {
    %c0_i32 = arith.constant 0 : i32
    %c0_i32_0 = arith.constant 0 : i32
    %c0_i32_1 = arith.constant 0 : i32
    return %arg0, %c0_i32, %c0_i32_0 : i32, i32, i32
  }
}

</mosaic_0001>

<bundles_post_ra>
// kernel: bottleneck_block_forward.1
= control target key start
LH: loop header
LB: loop body
LE: loop exit
PB: predicated region body
PF: predicated region fallthrough
CT: control target
= control target key end

     0   :  { %s1747_s24 = smov 0   ;;  %s2429_s0 = inlined_call_operand.vmem [shape: f32[2,4,256], index: 0, kind: input, shape index: {}]   ;;  %s2430_s1 = inlined_call_operand.vmem [shape: f32[9,256], index: 1, kind: input, shape index: {}]   ;;  %s2431_s2 = inlined_call_operand.vmem [shape: f32[4,1], index: 2, kind: input, shape index: {}]   ;;  %s2432_s3 = inlined_call_operand.vmem [shape: f32[4,1], index: 3, kind: input, shape index: {}]   ;;  %s2433_s4 = inlined_call_operand.vmem [shape: f32[32,4], index: 4, kind: input, shape index: {}]   ;;  %s2434_s5 = inlined_call_operand.vmem [shape: f32[32,1], index: 5, kind: input, shape index: {}]   ;;  %s2435_s6 = inlined_call_operand.vmem [shape: f32[9,8,32], index: 6, kind: input, shape index: {}]   ;;  %s2436_s7 = inlined_call_operand.vmem [shape: f32[2,12,256], index: 7, kind: output, shape index: {}]  }
   0x1 LB: > { %s1548_s25 = sadd.s32 4294967295, %s1694_s24   ;;  %p1552_p0 = scmp.ge.s32.totalorder %s1694_s24, 1  ;;  %s1694_s24 = sphi %s1747_s24, %s17_s24  }
   0x2   : > { %p237_p1 = scmp.lt.s32.totalorder %s1694_s24, 3 }
   0x4   : > { %p238_p2 = pnand %p1552_p0, %p237_p1 }
   0x6   : > { %241 = sbr.rel (%p238_p2) target bundleno = 845 (0x34d), region = 48 }
   0xd   : > { %v283_v0 = vld [vmem:[%s2431_s2] sm:$0xf]  ;;  %v1696_v1 = vmov 0   ;;  %v291_v3 = vld [vmem:[%s2434_s5 + $0x10] sm:$0xff]  ;;  %v2437_v4 = vmov 0.0   ;;  %v290_v6 = vld [vmem:[%s2434_s5 + $0x8] sm:$0xff]  ;;  %v310_v10 = vlaneseq }
   0xe   : > { %1685 = vset.pattern.permute.xlu0 %v1696_v1  ;;  %1686 = vset.pattern.permute.xlu1 %v1696_v1  ;;  %v284_v2 = vld [vmem:[%s2432_s3] sm:$0xf]  ;;  %v292_v7 = vld [vmem:[%s2434_s5 + $0x18] sm:$0xff]  ;;  %p269_p3 = scmp.lt.s32.totalorder %s1548_s25, 1  ;;  %v1698_v8 = vmov 839922192  }
   0xf   : > { %305 = vperm.xlu0 %1685, %v283_v0   ;;  %434 = vmatprep.mubr.f32.mxu0 %v2437_v4  ;;  %v289_v5 = vld [vmem:[%s2434_s5] sm:$0xff]  ;;  %v308_v9 = vunpack.c.l.s4 %v1698_v8  ;;  %v1778_v12 = vshrl.u32 %v310_v10, 7  ;;  %vm365_vm0 = vcmask 1043456   ;;  %vm352_vm1 = vcmask 31744   ;;  %v286_v24 = vld [vmem:[%s2433_s4 + $0x8] sm:$0xff]  ;;  %v287_v25 = vld [vmem:[%s2433_s4 + $0x10] sm:$0xff] }
  0x10   : > { %1001 = vmatprep.mubr.f32.mxu1 %v2437_v4  ;;  %332 = vperm.xlu1 %1686, %v289_v5   ;;  %s2486_s25 = smov (!%p269_p3, %s1548_s25), 1  ;;  %v285_v23 = vld [vmem:[%s2433_s4] sm:$0xff]  ;;  %v288_v26 = vld [vmem:[%s2433_s4 + $0x18] sm:$0xff]  ;;  %s1699_s29 = smov 16   ;;  %vm551_vm2 = vcmask 261120  }
  0x11   : > { %v309_v11 = vunpack.c.0.s8 %v308_v9  ;;  %s1576_s15 = sshll.u32 %s2486_s25, 3  ;;  %s1700_s30 = smov 127   ;;  %v297_v59 = vld [vmem:[%s2435_s6 + $0x20] sm:$0xff] }
  0x12   : > { %s273_s18 = scalar_lea.vmem %s2429_s0, %s1576_s15  ;;  %s1701_s8 = smov 17  }
  0x13   : > { %318 = vperm.xlu0 %1685, %v284_v2   ;;  %v312_v13 = vsub.s32 %v309_v11, %v1778_v12  ;;  %v1785_v16 = vld [vmem:[%s273_s18] sm:$0xff]  ;;  %s1702_s9 = smov 113   ;;  %s1703_s10 = smov 15   ;;  %v1936_v11 = vand.u32 127, %v310_v10 }
  0x14   : > { %337 = vperm.xlu1 %1686, %v290_v6   ;;  %2452 = vst [vmem:[#allocation2_spill] sm:$0xff] %v1785_v16  ;;  %s1704_s11 = smov 112   ;;  %s1705_s12 = smov 1  }
  0x15   : > { %s1706_s13 = smov 111   ;;  %vm526_vm3 = vcmp.lt.s32.totalorder %v1936_v11, 16  ;;  %vm1026_vm4 = vcmp.lt.s32.totalorder %v1936_v11, 127  ;;  %vm485_vm5 = vcmp.lt.s32.totalorder %v1936_v11, 17  ;;  %vm1143_vm6 = vcmp.lt.s32.totalorder %v1936_v11, 113  ;;  %s1577_s19 = sshll.u32 %s2486_s25, 5 }
  0x16   : > { %vm716_vm7 = vcmp.lt.s32.totalorder %v1936_v11, 15  ;;  %vm1260_vm8 = vcmp.lt.s32.totalorder %v1936_v11, 112  ;;  %vm833_vm9 = vcmp.lt.s32.totalorder %v1936_v11, 1  ;;  %vm1377_vm10 = vcmp.lt.s32.totalorder %v1936_v11, 111  ;;  %v296_v11 = vld [vmem:[%s2435_s6 + $0x18] sm:$0xff]  ;;  %s278_s22 = scalar_lea.vmem %s2436_s7, %s1577_s19 }
  0x17   : > { %342 = vperm.xlu0 %1685, %v291_v3  }
  0x18   : > { %347 = vperm.xlu1 %1686, %v292_v7  }
  0x8e   : > { %v306_v14 = vpop.permute.xlu0 %305 }
  0x8f   : > { %v313_v15 = vrot.slane %v306_v14, %v312_v13  ;;  %v333_v27 = vpop.permute.xlu1 %332 }
  0x91   : > { %v315_v18 = vmul.f32 %v313_v15, %v1785_v16  ;;  %v537_v15 = vsub.s32 1, %v1778_v12 }
  0x92   : > { %v319_v17 = vpop.permute.xlu0 %318 }
  0x93   : > { %v326_v19 = vrot.slane %v319_v17, %v312_v13  ;;  %v338_v32 = vpop.permute.xlu1 %337  ;;  %v1946_v17 = vld [vmem:[%s2430_s1] sm:$0xff] }
  0x95   : > { %v328_v20 = vadd.f32 %v326_v19, %v315_v18  ;;  %v1951_v18 = vld [vmem:[%s2430_s1 + $0x8] sm:$0xff]  ;;  %v1037_v19 = vsub.s32 5, %v1778_v12 }
  0x96   : > { %v343_v45 = vpop.permute.xlu0 %342 }
  0x97   : > { %v329_v21 = vmax.f32 %v328_v20, 0.0  ;;  %v348_v46 = vpop.permute.xlu1 %347 }
  0x99   : > { %v351_v22 = vcombine.high %v329_v21, %v329_v21 }
  0x9b   : > { %1557 = vmatprep.subr.msk.mxu0 %vm365_vm0, %v351_v22  ;;  %v1959_v22 = vrot.slane %v1946_v17, %v537_v15 }
  0x9c   : > { %1558 = vmatpush1.msk.msra.mxu0 %vm365_vm0, %v329_v21  ;;  %v496_v21 = vsub.s32 0, %v1778_v12 }
  0x9d   : > { %1559 = vmatmul.mubr.msk.f32.vlgmr.msra.gmra.mrb[0].mxu0 %vm352_vm1, %v285_v23  ;;  %v1962_v23 = vrot.slane %v1951_v18, %v537_v15 }
  0x9e   : > { %440 = vmatprep.mubr.f32.mxu0 %v2437_v4 }
  0xa1   : > { %1560 = vmatmul.mubr.msk.f32.gmra.mrb[2].mxu0 %vm352_vm1, %v286_v24 }
  0xa2   : > { %446 = vmatprep.mubr.f32.mxu0 %v2437_v4 }
  0xa5   : > { %1561 = vmatmul.mubr.msk.f32.gmra.mrb[4].mxu0 %vm352_vm1, %v287_v25 }
  0xa6   : > { %452 = vmatprep.mubr.f32.mxu0 %v2437_v4 }
  0xa9   : > { %1562 = vmatmul.mubr.msk.f32.gmra.mrb[6].mxu0 %vm352_vm1, %v288_v26  ;;  %v1970_v26 = vrot.slane %v1946_v17, %v1037_v19 }
  0xaa   : > { %619 = vmatprep.mubr.f32.mxu0 %v2437_v4 }
 0x170   : > { %v436_v28 = vpop.f32.mrb[0].mxu0 }
 0x171   : > { %v437_v29 = vadd.f32 %v436_v28, %v333_v27  ;;  %v438_v30 = vpop.f32.mrb[1].mxu0 }
 0x172   : > { %v439_v33 = vadd.f32 %v438_v30, %v333_v27  ;;  %v1154_v27 = vsub.s32 6, %v1778_v12 }
 0x173   : > { %v459_v31 = vmax.f32 %v437_v29, 0.0  ;;  %v1974_v29 = vrot.slane %v1951_v18, %v1037_v19 }
 0x174   : > { %v442_v34 = vpop.f32.mrb[2].mxu0  ;;  %v1807_v39 = vmax.f32 %v439_v33, 0.0 }
 0x175   : > { %v443_v35 = vadd.f32 %v442_v34, %v338_v32  ;;  %v444_v36 = vpop.f32.mrb[3].mxu0  ;;  %510 = vrot.lane.b32.xlu0 %v459_v31, %s1699_s29 }
 0x176   : > { %v445_v37 = vadd.f32 %v444_v36, %v338_v32  ;;  %v1981_v32 = vrot.slane %v1951_v18, %v496_v21 }
 0x177   : > { %v461_v38 = vmax.f32 %v443_v35, 0.0 }
 0x178   : > { %v1809_v40 = vmax.f32 %v445_v37, 0.0  ;;  %v448_v41 = vpop.f32.mrb[4].mxu0 }
 0x179   : > { %v450_v42 = vpop.f32.mrb[5].mxu0  ;;  %512 = vrot.lane.b32.xlu1 %v461_v38, %s1699_s29  ;;  %1010 = vrot.lane.b32.xlu0 %v459_v31, %s1700_s30  ;;  %v1612_v43 = vpack.c.bf16 %v461_v38, %v459_v31  ;;  %v449_v51 = vadd.f32 %v448_v41, %v343_v45  ;;  %v1997_v41 = vrot.slane %v1946_v17, %v1154_v27 }
 0x17a   : > { %v1610_v44 = vpack.c.bf16 %v1809_v40, %v1807_v39  ;;  %v451_v47 = vadd.f32 %v450_v42, %v343_v45  ;;  %v2000_v42 = vrot.slane %v1951_v18, %v1154_v27 }
 0x17b   : > { %v463_v56 = vmax.f32 %v449_v51, 0.0 }
 0x17c   : > { %v454_v48 = vpop.f32.mrb[6].mxu0  ;;  %1611 = vmatprep.subr.bf16.mxu1 %v1610_v44  ;;  %v1817_v53 = vmax.f32 %v451_v47, 0.0 }
 0x17d   : > { %v455_v49 = vadd.f32 %v454_v48, %v348_v46  ;;  %v456_v50 = vpop.f32.mrb[7].mxu0  ;;  %1012 = vrot.lane.b32.xlu1 %v461_v38, %s1700_s30  ;;  %467 = vrot.lane.b32.xlu0 %v459_v31, %s1701_s8 }
 0x17e   : > { %v457_v52 = vadd.f32 %v456_v50, %v348_v46  ;;  %1613 = vmatpush1.bf16.msra.mxu1 %v1612_v43  ;;  %v727_v43 = vsub.s32 2, %v1778_v12 }
 0x17f   : > { %v465_v54 = vmax.f32 %v455_v49, 0.0 }
 0x180   : > { %v1819_v55 = vmax.f32 %v457_v52, 0.0 }
 0x181   : > { %469 = vrot.lane.b32.xlu1 %v461_v38, %s1701_s8  ;;  %1127 = vrot.lane.b32.xlu0 %v459_v31, %s1702_s9  ;;  %v1616_v58 = vpack.c.bf16 %v465_v54, %v463_v56 }
 0x182   : > { %v1614_v57 = vpack.c.bf16 %v1819_v55, %v1817_v53 }
 0x184   : > { %1615 = vmatprep.subr.bf16.mxu1 %v1614_v57 }
 0x185   : > { %1129 = vrot.lane.b32.xlu1 %v461_v38, %s1702_s9  ;;  %700 = vrot.lane.b32.xlu0 %v459_v31, %s1703_s10 }
 0x186   : > { %1617 = vmatpush1.bf16.msra.mxu1 %v1616_v58  ;;  %v1271_v58 = vsub.s32 7, %v1778_v12 }
 0x189   : > { %702 = vrot.lane.b32.xlu1 %v461_v38, %s1703_s10  ;;  %1244 = vrot.lane.b32.xlu0 %v459_v31, %s1704_s11 }
 0x18a   : > { %1567 = vmatmul.mubr.msk.f32.vlgmr.msra.gmra.mrb[0].mxu1 %vm551_vm2, %v297_v59 }
 0x18b   : > { %1118 = vmatprep.mubr.f32.mxu1 %v2437_v4 }
 0x18d   : > { %1246 = vrot.lane.b32.xlu1 %v461_v38, %s1704_s11  ;;  %817 = vrot.lane.b32.xlu0 %v459_v31, %s1705_s12 }
 0x191   : > { %819 = vrot.lane.b32.xlu1 %v461_v38, %s1705_s12  ;;  %1361 = vrot.lane.b32.xlu0 %v459_v31, %s1706_s13  ;;  %v1978_v31 = vrot.slane %v1946_v17, %v496_v21 }
 0x195   : > { %1363 = vrot.lane.b32.xlu1 %v461_v38, %s1706_s13  ;;  %518 = vrot.lane.b32.xlu0 %v1807_v39, %s1699_s29 }
 0x199   : > { %520 = vrot.lane.b32.xlu1 %v1809_v40, %s1699_s29  ;;  %1018 = vrot.lane.b32.xlu0 %v1807_v39, %s1700_s30 }
 0x19d   : > { %1020 = vrot.lane.b32.xlu1 %v1809_v40, %s1700_s30  ;;  %475 = vrot.lane.b32.xlu0 %v1807_v39, %s1701_s8 }
 0x1a1   : > { %477 = vrot.lane.b32.xlu1 %v1809_v40, %s1701_s8  ;;  %1135 = vrot.lane.b32.xlu0 %v1807_v39, %s1702_s9 }
 0x1a5   : > { %1137 = vrot.lane.b32.xlu1 %v1809_v40, %s1702_s9  ;;  %708 = vrot.lane.b32.xlu0 %v1807_v39, %s1703_s10 }
 0x1a9   : > { %710 = vrot.lane.b32.xlu1 %v1809_v40, %s1703_s10  ;;  %1252 = vrot.lane.b32.xlu0 %v1807_v39, %s1704_s11 }
 0x1ad   : > { %1254 = vrot.lane.b32.xlu1 %v1809_v40, %s1704_s11  ;;  %825 = vrot.lane.b32.xlu0 %v1807_v39, %s1705_s12 }
 0x1b1   : > { %827 = vrot.lane.b32.xlu1 %v1809_v40, %s1705_s12  ;;  %1369 = vrot.lane.b32.xlu0 %v1807_v39, %s1706_s13 }
 0x1b5   : > { %1371 = vrot.lane.b32.xlu1 %v1809_v40, %s1706_s13  ;;  %514 = vrot.lane.b32.xlu0 %v463_v56, %s1699_s29 }
 0x1b9   : > { %516 = vrot.lane.b32.xlu1 %v465_v54, %s1699_s29  ;;  %1014 = vrot.lane.b32.xlu0 %v463_v56, %s1700_s30 }
 0x1bd   : > { %1016 = vrot.lane.b32.xlu1 %v465_v54, %s1700_s30  ;;  %471 = vrot.lane.b32.xlu0 %v463_v56, %s1701_s8 }
 0x1c1   : > { %473 = vrot.lane.b32.xlu1 %v465_v54, %s1701_s8  ;;  %1131 = vrot.lane.b32.xlu0 %v463_v56, %s1702_s9 }
 0x1c5   : > { %1133 = vrot.lane.b32.xlu1 %v465_v54, %s1702_s9  ;;  %704 = vrot.lane.b32.xlu0 %v463_v56, %s1703_s10 }
 0x1c9   : > { %706 = vrot.lane.b32.xlu1 %v465_v54, %s1703_s10  ;;  %1248 = vrot.lane.b32.xlu0 %v463_v56, %s1704_s11 }
 0x1cd   : > { %1250 = vrot.lane.b32.xlu1 %v465_v54, %s1704_s11  ;;  %821 = vrot.lane.b32.xlu0 %v463_v56, %s1705_s12 }
 0x1d1   : > { %823 = vrot.lane.b32.xlu1 %v465_v54, %s1705_s12  ;;  %1365 = vrot.lane.b32.xlu0 %v463_v56, %s1706_s13 }
 0x1d5   : > { %1367 = vrot.lane.b32.xlu1 %v465_v54, %s1706_s13  ;;  %522 = vrot.lane.b32.xlu0 %v1817_v53, %s1699_s29 }
 0x1d9   : > { %524 = vrot.lane.b32.xlu1 %v1819_v55, %s1699_s29  ;;  %1022 = vrot.lane.b32.xlu0 %v1817_v53, %s1700_s30 }
 0x1dd   : > { %1024 = vrot.lane.b32.xlu1 %v1819_v55, %s1700_s30  ;;  %479 = vrot.lane.b32.xlu0 %v1817_v53, %s1701_s8 }
 0x1e1   : > { %481 = vrot.lane.b32.xlu1 %v1819_v55, %s1701_s8  ;;  %1139 = vrot.lane.b32.xlu0 %v1817_v53, %s1702_s9 }
 0x1e5   : > { %1141 = vrot.lane.b32.xlu1 %v1819_v55, %s1702_s9  ;;  %712 = vrot.lane.b32.xlu0 %v1817_v53, %s1703_s10 }
 0x1e7   : > { %v511_v60 = vpop.permute.xlu0 %510 }
 0x1e9   : > { %714 = vrot.lane.b32.xlu1 %v1819_v55, %s1703_s10  ;;  %1256 = vrot.lane.b32.xlu0 %v1817_v53, %s1704_s11 }
 0x1eb   : > { %v513_v61 = vpop.permute.xlu1 %512  ;;  %v1011_v62 = vpop.permute.xlu0 %1010 }
 0x1ed   : > { %1258 = vrot.lane.b32.xlu1 %v1819_v55, %s1704_s11  ;;  %829 = vrot.lane.b32.xlu0 %v1817_v53, %s1705_s12 }
 0x1ef   : > { %v1013_v63 = vpop.permute.xlu1 %1012  ;;  %v468_v0 = vpop.permute.xlu0 %467 }
 0x1f1   : > { %831 = vrot.lane.b32.xlu1 %v1819_v55, %s1705_s12  ;;  %1373 = vrot.lane.b32.xlu0 %v1817_v53, %s1706_s13 }
 0x1f3   : > { %v1917_v1 = vpop.permute.xlu1 %469  ;;  %v1919_v2 = vpop.permute.xlu0 %1127 }
 0x1f5   : > { %1375 = vrot.lane.b32.xlu1 %v1819_v55, %s1706_s13 }
 0x1f7   : > { %v1923_v3 = vpop.permute.xlu1 %1129  ;;  %v1925_v5 = vpop.permute.xlu0 %700 }
 0x1fb   : > { %v1927_v6 = vpop.permute.xlu1 %702  ;;  %v1929_v7 = vpop.permute.xlu0 %1244 }
 0x1ff   : > { %v1931_v8 = vpop.permute.xlu1 %1246  ;;  %v1933_v9 = vpop.permute.xlu0 %817 }
 0x203   : > { %v1938_v13 = vpop.permute.xlu1 %819  ;;  %v1940_v14 = vpop.permute.xlu0 %1361 }
 0x207   : > { %v1954_v10 = vpop.permute.xlu1 %1363  ;;  %v519_v20 = vpop.permute.xlu0 %518 }
 0x208   : > { %v527_v24 = vsel %vm526_vm3, %v511_v60, %v519_v20  ;;  %v531_v25 = vsel %vm526_vm3, %v519_v20, %v511_v60 }
 0x209   : > { %v543_v37 = vmul.f32 %v1959_v22, %v531_v25  ;;  %v544_v38 = vmul.f32 %v1962_v23, %v527_v24 }
 0x20b   : > { %v521_v28 = vpop.permute.xlu1 %520  ;;  %v1019_v30 = vpop.permute.xlu0 %1018 }
 0x20c   : > { %v528_v33 = vsel %vm526_vm3, %v513_v61, %v521_v28  ;;  %v532_v34 = vsel %vm526_vm3, %v521_v28, %v513_v61  ;;  %v1027_v35 = vsel %vm1026_vm4, %v1011_v62, %v1019_v30  ;;  %v1031_v36 = vsel %vm1026_vm4, %v1019_v30, %v1011_v62 }
 0x20d   : > { %v545_v39 = vmul.f32 %v1959_v22, %v532_v34  ;;  %v546_v40 = vmul.f32 %v1962_v23, %v528_v33  ;;  %v1043_v45 = vmul.f32 %v1970_v26, %v1027_v35  ;;  %v1044_v46 = vmul.f32 %v1974_v29, %v1031_v36 }
 0x20e   : > { %v2060_v34 = vrot.slane %v1951_v18, %v1271_v58  ;;  %v844_v35 = vsub.s32 3, %v1778_v12 }
 0x20f   : > { %v1580_v44 = vpack.c.bf16 %v545_v39, %v543_v37  ;;  %v1021_v47 = vpop.permute.xlu1 %1020  ;;  %v476_v48 = vpop.permute.xlu0 %475  ;;  %v1578_v49 = vpack.c.bf16 %v546_v40, %v544_v38 }
 0x210   : > { %v1028_v50 = vsel %vm1026_vm4, %v1013_v63, %v1021_v47  ;;  %v1032_v51 = vsel %vm1026_vm4, %v1021_v47, %v1013_v63  ;;  %v486_v52 = vsel %vm485_vm5, %v468_v0, %v476_v48  ;;  %v490_v53 = vsel %vm485_vm5, %v476_v48, %v468_v0 }
 0x211   : > { %v1045_v54 = vmul.f32 %v1970_v26, %v1028_v50  ;;  %v1046_v55 = vmul.f32 %v1974_v29, %v1032_v51  ;;  %v2016_v56 = vmul.f32 %v1978_v31, %v490_v53  ;;  %v2019_v57 = vmul.f32 %v1981_v32, %v486_v52  ;;  %1579 = vmatprep.subr.bf16.mxu0 %v1578_v49 }
 0x212   : > { %1581 = vmatpush1.bf16.msra.mxu0 %v1580_v44  ;;  %v2024_v63 = vrot.slane %v1946_v17, %v727_v43  ;;  %v2027_v0 = vrot.slane %v1951_v18, %v727_v43  ;;  %v2096_v48 = vrot.slane %v1951_v18, %v844_v35 }
 0x213   : > { %v1620_v59 = vpack.c.bf16 %v1045_v54, %v1043_v45  ;;  %v478_v60 = vpop.permute.xlu1 %477  ;;  %v1136_v61 = vpop.permute.xlu0 %1135  ;;  %v1618_v62 = vpack.c.bf16 %v1046_v55, %v1044_v46 }
 0x214   : > { %v487_v15 = vsel %vm485_vm5, %v1917_v1, %v478_v60  ;;  %v491_v19 = vsel %vm485_vm5, %v478_v60, %v1917_v1  ;;  %v1144_v20 = vsel %vm1143_vm6, %v1919_v2, %v1136_v61  ;;  %v1148_v21 = vsel %vm1143_vm6, %v1136_v61, %v1919_v2 }
 0x215   : > { %v2042_v24 = vmul.f32 %v1978_v31, %v491_v19  ;;  %v2045_v25 = vmul.f32 %v1981_v32, %v487_v15  ;;  %v2048_v27 = vmul.f32 %v1997_v41, %v1144_v20  ;;  %v2051_v28 = vmul.f32 %v2000_v42, %v1148_v21  ;;  %1619 = vmatprep.subr.bf16.mxu1 %v1618_v62 }
 0x216   : > { %1621 = vmatpush1.bf16.msra.mxu1 %v1620_v59  ;;  %v2055_v1 = vrot.slane %v1946_v17, %v1271_v58 }
 0x217   : > { %v1138_v30 = vpop.permute.xlu1 %1137  ;;  %v709_v33 = vpop.permute.xlu0 %708 }
 0x218   : > { %v1145_v37 = vsel %vm1143_vm6, %v1923_v3, %v1138_v30  ;;  %v1149_v38 = vsel %vm1143_vm6, %v1138_v30, %v1923_v3  ;;  %v717_v39 = vsel %vm716_vm7, %v1925_v5, %v709_v33  ;;  %v721_v40 = vsel %vm716_vm7, %v709_v33, %v1925_v5 }
 0x219   : > { %v2078_v12 = vmul.f32 %v1997_v41, %v1145_v37  ;;  %v2081_v43 = vmul.f32 %v2000_v42, %v1149_v38  ;;  %v2084_v44 = vmul.f32 %v2024_v63, %v721_v40  ;;  %v2087_v45 = vmul.f32 %v2027_v0, %v717_v39 }
 0x21a   : > { %v2093_v5 = vrot.slane %v1946_v17, %v844_v35 }
 0x21b   : > { %v711_v46 = vpop.permute.xlu1 %710  ;;  %v1253_v47 = vpop.permute.xlu0 %1252 }
 0x21c   : > { %v718_v50 = vsel %vm716_vm7, %v1927_v6, %v711_v46  ;;  %v722_v51 = vsel %vm716_vm7, %v711_v46, %v1927_v6  ;;  %v1261_v52 = vsel %vm1260_vm8, %v1929_v7, %v1253_v47  ;;  %v1265_v17 = vsel %vm1260_vm8, %v1253_v47, %v1929_v7 }
 0x21d   : > { %v2113_v18 = vmul.f32 %v2024_v63, %v722_v51  ;;  %v2116_v53 = vmul.f32 %v2027_v0, %v718_v50  ;;  %v2119_v54 = vmul.f32 %v2055_v1, %v1261_v52  ;;  %v2122_v55 = vmul.f32 %v2060_v34, %v1265_v17  ;;  %v2178_v50 = vld [vmem:[%s2430_s1 + $0x10] ss:$0 sm:$0xff] }
 0x21e   : > { %2455 = vst [vmem:[#allocation5_spill] sm:$0xff] %v2178_v50 }
 0x21f   : > { %v1255_v58 = vpop.permute.xlu1 %1254  ;;  %v826_v59 = vpop.permute.xlu0 %825 }
 0x220   : > { %v1262_v60 = vsel %vm1260_vm8, %v1931_v8, %v1255_v58  ;;  %v1266_v61 = vsel %vm1260_vm8, %v1255_v58, %v1931_v8  ;;  %v834_v62 = vsel %vm833_vm9, %v1933_v9, %v826_v59  ;;  %v838_v15 = vsel %vm833_vm9, %v826_v59, %v1933_v9 }
 0x221   : > { %v2142_v19 = vmul.f32 %v2055_v1, %v1262_v60  ;;  %v2145_v20 = vmul.f32 %v2060_v34, %v1266_v61  ;;  %v2148_v21 = vmul.f32 %v2093_v5, %v838_v15  ;;  %v2151_v30 = vmul.f32 %v2096_v48, %v834_v62 }
 0x223   : > { %2453 = vst [vmem:[#allocation3_spill] sm:$0xff] %v2148_v21  ;;  %v828_v33 = vpop.permute.xlu1 %827  ;;  %v1370_v35 = vpop.permute.xlu0 %1369 }
 0x224   : > { %v835_v37 = vsel %vm833_vm9, %v1938_v13, %v828_v33  ;;  %v839_v38 = vsel %vm833_vm9, %v828_v33, %v1938_v13  ;;  %v1378_v39 = vsel %vm1377_vm10, %v1940_v14, %v1370_v35  ;;  %v1382_v40 = vsel %vm1377_vm10, %v1370_v35, %v1940_v14  ;;  %v2183_v13 = vld [vmem:[%s2430_s1 + $0x18] ss:$0 sm:$0xff] }
 0x225   : > { %v2170_v46 = vmul.f32 %v2093_v5, %v839_v38  ;;  %v2173_v47 = vmul.f32 %v2096_v48, %v835_v37  ;;  %2456 = vst [vmem:[#allocation6_spill] sm:$0xff] %v2183_v13  ;;  %v2196_v60 = vmul.f32 %v2178_v50, %v1378_v39  ;;  %v2199_v61 = vmul.f32 %v2183_v13, %v1382_v40 }
 0x227   : > { %2454 = vst [vmem:[#allocation4_spill] sm:$0xff] %v2170_v46  ;;  %v1372_v14 = vpop.permute.xlu1 %1371  ;;  %v515_v52 = vpop.permute.xlu0 %514  ;;  %2457 = vst [vmem:[#allocation7_spill] sm:$0xff] %v2196_v60 }
 0x228   : > { %v1379_v58 = vsel %vm1377_vm10, %v1954_v10, %v1372_v14  ;;  %v1383_v59 = vsel %vm1377_vm10, %v1372_v14, %v1954_v10  ;;  %2458 = vst [vmem:[#allocation8_spill] sm:$0xff] %v2199_v61 }
 0x229   : > { %v2202_v62 = vmul.f32 %v2178_v50, %v1379_v58  ;;  %v2205_v15 = vmul.f32 %v2183_v13, %v1383_v59 }
 0x22b   : > { %2459 = vst [vmem:[#allocation9_spill] sm:$0xff] %v2202_v62  ;;  %2460 = vst [vmem:[#allocation10_spill] sm:$0xff] %v2205_v15  ;;  %v517_v35 = vpop.permute.xlu1 %516  ;;  %v1015_v37 = vpop.permute.xlu0 %1014 }
 0x22f   : > { %v1017_v38 = vpop.permute.xlu1 %1016  ;;  %v472_v39 = vpop.permute.xlu0 %471 }
 0x233   : > { %v474_v14 = vpop.permute.xlu1 %473  ;;  %v1132_v51 = vpop.permute.xlu0 %1131 }
 0x237   : > { %v2211_v40 = vpop.permute.xlu1 %1133  ;;  %v2213_v17 = vpop.permute.xlu0 %704 }
 0x23b   : > { %v2215_v58 = vpop.permute.xlu1 %706  ;;  %v2217_v59 = vpop.permute.xlu0 %1248 }
 0x23f   : > { %v2219_v8 = vpop.permute.xlu1 %1250  ;;  %v2221_v33 = vpop.permute.xlu0 %821 }
 0x243   : > { %v2223_v9 = vpop.permute.xlu1 %823  ;;  %v2225_v6 = vpop.permute.xlu0 %1365 }
 0x247   : > { %v2227_v10 = vpop.permute.xlu1 %1367  ;;  %v523_v7 = vpop.permute.xlu0 %522 }
 0x248   : > { %2461 = vst [vmem:[#allocation11_spill] sm:$0xff] %v2227_v10  ;;  %v529_v3 = vsel %vm526_vm3, %v515_v52, %v523_v7  ;;  %v533_v49 = vsel %vm526_vm3, %v523_v7, %v515_v52 }
 0x249   : > { %v547_v13 = vmul.f32 %v1959_v22, %v533_v49  ;;  %v548_v50 = vmul.f32 %v1962_v23, %v529_v3 }
 0x24b   : > { %v525_v4 = vpop.permute.xlu1 %524  ;;  %v1023_v2 = vpop.permute.xlu0 %1022 }
 0x24c   : > { %v530_v36 = vsel %vm526_vm3, %v517_v35, %v525_v4  ;;  %v534_v16 = vsel %vm526_vm3, %v525_v4, %v517_v35  ;;  %v1029_v60 = vsel %vm1026_vm4, %v1015_v37, %v1023_v2  ;;  %v1033_v62 = vsel %vm1026_vm4, %v1023_v2, %v1015_v37 }
 0x24d   : > { %v549_v7 = vmul.f32 %v1959_v22, %v534_v16  ;;  %v550_v52 = vmul.f32 %v1962_v23, %v530_v36  ;;  %v1047_v15 = vmul.f32 %v1970_v26, %v1029_v60  ;;  %v1048_v10 = vmul.f32 %v1974_v29, %v1033_v62 }
 0x24e   : > { %v2462_v62 = vpack.c.bf16 %v2045_v25, %v2019_v57 }
 0x24f   : > { %v1584_v61 = vpack.c.bf16 %v549_v7, %v547_v13  ;;  %v1025_v4 = vpop.permute.xlu1 %1024  ;;  %v480_v35 = vpop.permute.xlu0 %479  ;;  %v1582_v21 = vpack.c.bf16 %v550_v52, %v548_v50  ;;  %v294_v50 = vld [vmem:[%s2435_s6 + $0x8] sm:$0xff] }
 0x250   : > { %v1030_v46 = vsel %vm1026_vm4, %v1017_v38, %v1025_v4  ;;  %v1034_v2 = vsel %vm1026_vm4, %v1025_v4, %v1017_v38  ;;  %v488_v3 = vsel %vm485_vm5, %v472_v39, %v480_v35  ;;  %v492_v16 = vsel %vm485_vm5, %v480_v35, %v472_v39 }
 0x251   : > { %v1049_v22 = vmul.f32 %v1970_v26, %v1030_v46  ;;  %v1050_v23 = vmul.f32 %v1974_v29, %v1034_v2  ;;  %v506_v36 = vmul.f32 %v1978_v31, %v492_v16  ;;  %v507_v49 = vmul.f32 %v1981_v32, %v488_v3  ;;  %1583 = vmatprep.subr.bf16.mxu0 %v1582_v21 }
 0x252   : > { %1585 = vmatpush1.bf16.msra.mxu0 %v1584_v61  ;;  %v2465_v35 = vpack.c.bf16 %v2081_v43, %v2051_v28  ;;  %v2466_v28 = vpack.c.bf16 %v2078_v12, %v2048_v27 }
 0x253   : > { %v1624_v13 = vpack.c.bf16 %v1049_v22, %v1047_v15  ;;  %v482_v60 = vpop.permute.xlu1 %481  ;;  %1587 = vmatprep.subr.bf16.mxu0 %v2462_v62  ;;  %v1140_v37 = vpop.permute.xlu0 %1139  ;;  %v1622_v26 = vpack.c.bf16 %v1050_v23, %v1048_v10  ;;  %v2463_v10 = vpack.c.bf16 %v2042_v24, %v2016_v56 }
 0x254   : > { %v489_v29 = vsel %vm485_vm5, %v474_v14, %v482_v60  ;;  %v493_v46 = vsel %vm485_vm5, %v482_v60, %v474_v14  ;;  %v1146_v21 = vsel %vm1143_vm6, %v1132_v51, %v1140_v37  ;;  %v1150_v61 = vsel %vm1143_vm6, %v1140_v37, %v1132_v51 }
 0x255   : > { %v508_v15 = vmul.f32 %v1978_v31, %v493_v46  ;;  %v509_v38 = vmul.f32 %v1981_v32, %v489_v29  ;;  %v1164_v57 = vmul.f32 %v1997_v41, %v1146_v21  ;;  %v1165_v25 = vmul.f32 %v2000_v42, %v1150_v61  ;;  %1563 = vmatmul.mubr.msk.f32.vlgmr.msra.gmra.mrb[8].mxu0 %vm551_vm2, %v294_v50  ;;  %v298_v31 = vld [vmem:[%s2435_s6 + $0x28] sm:$0xff] }
 0x256   : > { %1623 = vmatprep.subr.bf16.mxu1 %v1622_v26  ;;  %1589 = vmatpush1.bf16.msra.mxu0 %v2463_v10  ;;  %v2464_v32 = vmov 0.0   ;;  %v2469_v29 = vpack.c.bf16 %v2145_v20, %v2122_v55  ;;  %v2470_v55 = vpack.c.bf16 %v2142_v19, %v2119_v54  ;;  %v2472_v10 = vld [vmem:[#allocation4_spill] sm:$0xff] }
 0x257   : > { %v1592_v39 = vpack.c.bf16 %v508_v15, %v506_v36  ;;  %1625 = vmatpush1.bf16.msra.mxu1 %v1624_v13  ;;  %v1142_v14 = vpop.permute.xlu1 %1141  ;;  %v713_v7 = vpop.permute.xlu0 %712  ;;  %v1590_v51 = vpack.c.bf16 %v509_v38, %v507_v49  ;;  %693 = vmatprep.mubr.f32.mxu0 %v2464_v32 }
 0x258   : > { %v1147_v52 = vsel %vm1143_vm6, %v2211_v40, %v1142_v14  ;;  %v1151_v56 = vsel %vm1143_vm6, %v1142_v14, %v2211_v40  ;;  %v719_v24 = vsel %vm716_vm7, %v2213_v17, %v713_v7  ;;  %v723_v4 = vsel %vm716_vm7, %v713_v7, %v2213_v17  ;;  %1627 = vmatprep.subr.bf16.mxu1 %v2465_v35  ;;  %v293_v17 = vld [vmem:[%s2435_s6] sm:$0xff] }
 0x259   : > { %v1166_v2 = vmul.f32 %v1997_v41, %v1147_v52  ;;  %v1167_v3 = vmul.f32 %v2000_v42, %v1151_v56  ;;  %v737_v16 = vmul.f32 %v2024_v63, %v723_v4  ;;  %v738_v40 = vmul.f32 %v2027_v0, %v719_v24  ;;  %1591 = vmatprep.subr.bf16.mxu0 %v1590_v51  ;;  %v2475_v51 = vld [vmem:[#allocation11_spill] sm:$0xff]  ;;  %v2476_v52 = vld [vmem:[#allocation10_spill] sm:$0xff]  ;;  %v2477_v56 = vld [vmem:[#allocation8_spill] sm:$0xff] }
 0x25a   : > { %1568 = vmatmul.mubr.msk.f32.vlgmr.msra.gmra.mrb[0].mxu1 %vm551_vm2, %v298_v31  ;;  %1593 = vmatpush1.bf16.msra.mxu0 %v1592_v39  ;;  %v2467_v42 = vpack.c.bf16 %v2116_v53, %v2087_v45  ;;  %v2473_v39 = vld [vmem:[#allocation3_spill] sm:$0xff]  ;;  %v2478_v24 = vpack.c.bf16 %v2476_v52, %v2477_v56  ;;  %v2479_v4 = vld [vmem:[#allocation5_spill] sm:$0xff] }
 0x25b   : > { %v1632_v22 = vpack.c.bf16 %v1166_v2, %v1164_v57  ;;  %1629 = vmatpush1.bf16.msra.mxu1 %v2466_v28  ;;  %v715_v41 = vpop.permute.xlu1 %714  ;;  %v1257_v43 = vpop.permute.xlu0 %1256  ;;  %v1630_v23 = vpack.c.bf16 %v1167_v3, %v1165_v25  ;;  %1235 = vmatprep.mubr.f32.mxu1 %v2464_v32  ;;  %v2480_v2 = vld [vmem:[#allocation6_spill] sm:$0xff]  ;;  %v2482_v28 = vld [vmem:[#allocation7_spill] sm:$0xff] }
 0x25c   : > { %1595 = vmatprep.subr.bf16.mxu0 %v2467_v42  ;;  %v720_v36 = vsel %vm716_vm7, %v2215_v58, %v715_v41  ;;  %v724_v49 = vsel %vm716_vm7, %v715_v41, %v2215_v58  ;;  %v1263_v27 = vsel %vm1260_vm8, %v2217_v59, %v1257_v43  ;;  %v1267_v12 = vsel %vm1260_vm8, %v1257_v43, %v2217_v59  ;;  %v301_v43 = vld [vmem:[%s2435_s6 + $0x40] sm:$0xff] }
 0x25d   : > { %v739_v45 = vmul.f32 %v2024_v63, %v724_v49  ;;  %v740_v53 = vmul.f32 %v2027_v0, %v720_v36  ;;  %v1281_v50 = vmul.f32 %v2055_v1, %v1263_v27  ;;  %v1282_v13 = vmul.f32 %v2060_v34, %v1267_v12  ;;  %1564 = vmatmul.mubr.msk.f32.vlgmr.msra.gmra.mrb[8].mxu0 %vm551_vm2, %v293_v17  ;;  %v299_v63 = vld [vmem:[%s2435_s6 + $0x30] sm:$0xff] }
 0x25e   : > { %1631 = vmatprep.subr.bf16.mxu1 %v1630_v23  ;;  %v2468_v58 = vpack.c.bf16 %v2113_v18, %v2084_v44  ;;  %808 = vmatprep.mubr.f32.mxu0 %v2464_v32 }
 0x25f   : > { %v1600_v60 = vpack.c.bf16 %v739_v45, %v737_v16  ;;  %1633 = vmatpush1.bf16.msra.mxu1 %v1632_v22  ;;  %v1259_v59 = vpop.permute.xlu1 %1258  ;;  %v830_v62 = vpop.permute.xlu0 %829  ;;  %v1598_v37 = vpack.c.bf16 %v740_v53, %v738_v40  ;;  %v2481_v22 = vld [vmem:[#allocation9_spill] sm:$0xff]  ;;  %v2484_v45 = vld [vmem:[#allocation2_spill] sm:$0xff] }
 0x260   : > { %1597 = vmatpush1.bf16.msra.mxu0 %v2468_v58  ;;  %v1264_v0 = vsel %vm1260_vm8, %v2219_v8, %v1259_v59  ;;  %v1268_v44 = vsel %vm1260_vm8, %v1259_v59, %v2219_v8  ;;  %v836_v18 = vsel %vm833_vm9, %v2221_v33, %v830_v62  ;;  %v840_v26 = vsel %vm833_vm9, %v830_v62, %v2221_v33  ;;  %v295_v33 = vld [vmem:[%s2435_s6 + $0x10] sm:$0xff] }
 0x261   : > { %1635 = vmatprep.subr.bf16.mxu1 %v2469_v29  ;;  %v1283_v46 = vmul.f32 %v2055_v1, %v1264_v0  ;;  %v1284_v21 = vmul.f32 %v2060_v34, %v1268_v44  ;;  %v854_v61 = vmul.f32 %v2093_v5, %v840_v26  ;;  %v855_v8 = vmul.f32 %v2096_v48, %v836_v18 }
 0x262   : > { %1599 = vmatprep.subr.bf16.mxu0 %v1598_v37  ;;  %1569 = vmatmul.mubr.msk.f32.vlgmr.msra.gmra.mrb[0].mxu1 %vm551_vm2, %v299_v63  ;;  %v2471_v34 = vpack.c.bf16 %v2173_v47, %v2151_v30  ;;  %v2483_v41 = vpack.c.bf16 %v2481_v22, %v2482_v28  ;;  %v1479_v53 = vcombine.high %v2484_v45, %v2484_v45 }
 0x263   : > { %v1640_v15 = vpack.c.bf16 %v1283_v46, %v1281_v50  ;;  %1637 = vmatpush1.bf16.msra.mxu1 %v2470_v55  ;;  %v832_v1 = vpop.permute.xlu1 %831  ;;  %v1374_v20 = vpop.permute.xlu0 %1373  ;;  %v1638_v38 = vpack.c.bf16 %v1284_v21, %v1282_v13  ;;  %1352 = vmatprep.mubr.f32.mxu1 %v2464_v32 }
 0x264   : > { %1601 = vmatpush1.bf16.msra.mxu0 %v1600_v60  ;;  %v837_v57 = vsel %vm833_vm9, %v2223_v9, %v832_v1  ;;  %v841_v25 = vsel %vm833_vm9, %v832_v1, %v2223_v9  ;;  %v1380_v30 = vsel %vm1377_vm10, %v2225_v6, %v1374_v20  ;;  %v1384_v47 = vsel %vm1377_vm10, %v1374_v20, %v2225_v6 }
 0x265   : > { %1603 = vmatprep.subr.bf16.mxu0 %v2471_v34  ;;  %v856_v54 = vmul.f32 %v2093_v5, %v841_v25  ;;  %v857_v19 = vmul.f32 %v2096_v48, %v837_v57  ;;  %1639 = vmatprep.subr.bf16.mxu1 %v1638_v38  ;;  %v2474_v9 = vpack.c.bf16 %v2472_v10, %v2473_v39  ;;  %v300_v48 = vld [vmem:[%s2435_s6 + $0x38] sm:$0xff] }
 0x266   : > { %v1398_v35 = vmul.f32 %v2479_v4, %v1380_v30  ;;  %v1399_v3 = vmul.f32 %v2480_v2, %v1384_v47 }
 0x267   : > { %1565 = vmatmul.mubr.msk.f32.vlgmr.msra.gmra.mrb[8].mxu0 %vm551_vm2, %v295_v33  ;;  %v1608_v14 = vpack.c.bf16 %v856_v54, %v854_v61  ;;  %1641 = vmatpush1.bf16.msra.mxu1 %v1640_v15  ;;  %v1376_v5 = vpop.permute.xlu1 %1375  ;;  %v1606_v7 = vpack.c.bf16 %v857_v19, %v855_v8 }
 0x268   : > { %1605 = vmatpush1.bf16.msra.mxu0 %v2474_v9  ;;  %925 = vmatprep.mubr.f32.mxu0 %v2464_v32  ;;  %v1381_v31 = vsel %vm1377_vm10, %v2475_v51, %v1376_v5  ;;  %v1385_v6 = vsel %vm1377_vm10, %v1376_v5, %v2475_v51 }
 0x269   : > { %1643 = vmatprep.subr.bf16.mxu1 %v2478_v24  ;;  %v1400_v16 = vmul.f32 %v2479_v4, %v1381_v31  ;;  %v1401_v40 = vmul.f32 %v2480_v2, %v1385_v6  ;;  %1607 = vmatprep.subr.bf16.mxu0 %v1606_v7 }
 0x26a   : > { %1570 = vmatmul.mubr.msk.f32.vlgmr.msra.gmra.mrb[0].mxu1 %vm551_vm2, %v300_v48 }
 0x26b   : > { %v1648_v17 = vpack.c.bf16 %v1400_v16, %v1398_v35  ;;  %1645 = vmatpush1.bf16.msra.mxu1 %v2483_v41  ;;  %v1646_v42 = vpack.c.bf16 %v1401_v40, %v1399_v3  ;;  %1469 = vmatprep.mubr.f32.mxu1 %v2464_v32 }
 0x26c   : > { %1609 = vmatpush1.bf16.msra.mxu0 %v1608_v14 }
 0x26d   : > { %1647 = vmatprep.subr.bf16.mxu1 %v1646_v42 }
 0x26f   : > { %1566 = vmatmul.mubr.msk.f32.vlgmr.msra.gmra.mrb[8].mxu0 %vm551_vm2, %v296_v11  ;;  %1649 = vmatpush1.bf16.msra.mxu1 %v1648_v17 }
 0x272   : > { %1573 = vmatmul.mubr.msk.f32.vlgmr.msra.gmra.mrb[0].mxu1 %vm551_vm2, %v301_v43 }
 0x342   : > { %v927_v23 = vpop.f32.mrb[8].mxu0 }
 0x343   : > { %v929_v36 = vpop.f32.mrb[9].mxu0 }
 0x345   : > { %v1471_v49 = vpop.f32.mrb[0].mxu1 }
 0x346   : > { %v1650_v27 = vadd.f32 %v1471_v49, %v927_v23  ;;  %v1473_v12 = vpop.f32.mrb[1].mxu1 }
 0x347   : > { %v1651_v32 = vadd.f32 %v1473_v12, %v929_v36 }
 0x348   : > { %v1483_v50 = vrot.slane %v1650_v27, 4 }
 0x349   : > { %v1484_v13 = vrot.slane %v1651_v32, 4 }
 0x34a   : > { %v1487_v58 = vsel %vm365_vm0, %v2484_v45, %v1483_v50  ;;  %1491 = vst [vmem:[%s278_s22 + $0x10] sm:$0xf] %v1483_v50 }
 0x34b   : > { %1489 = vst [vmem:[%s278_s22] sm:$0xff] %v1487_v58  ;;  %v1488_v60 = vsel %vm365_vm0, %v1479_v53, %v1484_v13  ;;  %1492 = vst [vmem:[%s278_s22 + $0x18] sm:$0xf] %v1484_v13 }
 0x34c   : > { %1490 = vst [vmem:[%s278_s22 + $0x8] sm:$0xff] %v1488_v60 }
 0x34d PF: > { %s17_s24 = sadd.s32 1, %s1694_s24  }
 0x34e   : > { %p14_p4 = scmp.ge.s32.totalorder %s17_s24, 4  }
 0x350   :  { %16 = sbr.rel (!%p14_p4) target bundleno = 1 (0x1), region = 78 }

</bundles_post_ra>
